<compile_context>
chip_gen: v7x
topology: tpu7x:2x2x1
jax: 0.10.0
libtpu: 0.0.40
codegen_flags: <defaults>
</compile_context>

<pallas_src>
import functools

import jax
import jax.numpy as jnp
from jax import lax
from jax.experimental import pallas as pl
from jax.experimental.pallas import tpu as pltpu

_LANE = 128
_SUBLANE = 8


def _round_up(v, m):
    return (v + m - 1) // m * m


def _linear_small_kernel(x_ref, w_ref, b_ref, o_ref):
    # Tiny, invocation-overhead-bound regime: whole arrays resident in VMEM,
    # one MXU burst, exact f32 (matches torch).
    acc = lax.dot_general(x_ref[...], w_ref[...],
                          (((1,), (1,)), ((), ())),
                          preferred_element_type=jnp.float32)
    o_ref[...] = (acc + b_ref[...]).astype(o_ref.dtype)


def _linear_tiled_kernel(x_ref, w_ref, b_ref, o_ref, *, use_bf16_inputs):
    # Grid = (M/tm, N/tn, K/tk); K innermost ("arbitrary") so the f32 output
    # block stays resident across the reduction; M/N are "parallel" (megacore).
    @pl.when(pl.program_id(2) == 0)
    def _():
        # Bias init replaces zero-init + a separate finalize add/cast pass.
        o_ref[...] = jnp.broadcast_to(b_ref[...], o_ref.shape)

    a = x_ref[...]
    w = w_ref[...]
    if use_bf16_inputs:
        # bf16 MXU inputs, strictly f32 accumulation (o_ref is f32).
        a = a.astype(jnp.bfloat16)
        w = w.astype(jnp.bfloat16)
    # weight tile is (tn, tk): contract dim 1 of both (y = x @ W.T), so the
    # (N, K) parameter is used as-is — no HBM transpose pass.
    o_ref[...] += lax.dot_general(a, w, (((1,), (1,)), ((), ())),
                                  preferred_element_type=jnp.float32)


def linear_forward(x, weight, bias, *, tm=512, tn=512, tk=512,
                   use_bf16_inputs=True):
    """y = x @ weight.T + bias  (torch.nn.Linear forward).

    x: (M, K) f32, weight: (N, K) f32, bias: (N,) f32 -> (M, N) f32.
    """
    M, K = x.shape
    N, K2 = weight.shape
    assert K == K2 and bias.shape == (N,)

    if M <= 256 and N <= 256 and K <= 2048:
        # Small path: single whole-array VMEM block, no grid, exact f32.
        # Output padded to a lane multiple so stores are unmasked vst.
        m_pad = _round_up(M, _SUBLANE)
        n_pad = _round_up(N, _LANE)
        x_p = jnp.pad(x, ((0, m_pad - M), (0, 0)))
        w_p = jnp.pad(weight, ((0, n_pad - N), (0, 0)))
        b_p = jnp.pad(bias, (0, n_pad - N)).reshape(1, n_pad)
        vmem = pl.BlockSpec(memory_space=pltpu.MemorySpace.VMEM)
        out = pl.pallas_call(
            _linear_small_kernel,
            out_shape=jax.ShapeDtypeStruct((m_pad, n_pad), x.dtype),
            in_specs=[vmem, vmem, vmem],
            out_specs=vmem,
        )(x_p, w_p, b_p)
        return out[:M, :N]

    # ---- Tiled, software-pipelined path ----
    tm = max(_SUBLANE, min(tm, _round_up(M, _SUBLANE)))
    tn = max(_LANE, min(tn, _round_up(N, _LANE)))
    tk = max(_LANE, min(tk, _round_up(K, _LANE)))
    if K % tk != 0:
        # Prefer a tk that minimizes the (only required) zero-pad along K.
        k_aligned = _round_up(K, _LANE)
        if k_aligned <= 1024:
            tk = k_aligned

    # v7x megacore: make sure the product of the two "parallel" grid dims is
    # >= 2 so both TensorCores get output blocks.
    if pl.cdiv(M, tm) * pl.cdiv(N, tn) < 2 and M > _SUBLANE:
        tm = _round_up(max(tm // 2, _SUBLANE), _SUBLANE)

    k_pad = _round_up(K, tk)
    if k_pad != K:
        # Only the K axis needs explicit zero padding (reduction correctness).
        # Ragged M/N last blocks are handled by the grid: OOB reads only feed
        # rows/cols whose writes are dropped.
        x = jnp.pad(x, ((0, 0), (0, k_pad - K)))
        weight = jnp.pad(weight, ((0, 0), (0, k_pad - K)))
    b2 = bias.reshape(1, N)

    grid = (pl.cdiv(M, tm), pl.cdiv(N, tn), k_pad // tk)
    kernel = functools.partial(_linear_tiled_kernel,
                               use_bf16_inputs=use_bf16_inputs)
    out = pl.pallas_call(
        kernel,
        out_shape=jax.ShapeDtypeStruct((M, N), x.dtype),
        grid=grid,
        in_specs=[
            pl.BlockSpec((tm, tk), lambda i, j, k: (i, k)),
            pl.BlockSpec((tn, tk), lambda i, j, k: (j, k)),   # (N, K) weight, no transpose
            pl.BlockSpec((1, tn), lambda i, j, k: (0, j)),
        ],
        out_specs=pl.BlockSpec((tm, tn), lambda i, j, k: (i, j)),
        compiler_params=pltpu.CompilerParams(
            dimension_semantics=("parallel", "parallel", "arbitrary"),
        ),
    )(x, weight, b2)
    return out
    # TODO(synk): on v5e/v6e (128 MiB VMEM) tm=tn=1024 plus a raised
    # vmem_limit_bytes and pipeline_mode=pl.Buffered(3) on the x/w specs would
    # push closer to roofline; 512 defaults are chosen to also fit v7x's
    # 64 MiB-per-TensorCore VMEM without spilling.


if __name__ == "__main__":
    # Only input_dim/output_dim affect the forward pass; epochs/lr/scheduler_*
    # are training-only hyperparameters of the original module.
    input_dim = 32
    output_dim = 16
    batch = 8

    key = jax.random.PRNGKey(0)
    kx, kw, kb = jax.random.split(key, 3)

    # Deterministic init mimicking nn.Linear's uniform(-1/sqrt(K), 1/sqrt(K)).
    bound = 1.0 / jnp.sqrt(jnp.float32(input_dim))
    weight = jax.random.uniform(kw, (output_dim, input_dim), jnp.float32, -bound, bound)
    bias = jax.random.uniform(kb, (output_dim,), jnp.float32, -bound, bound)
    x = jax.random.normal(kx, (batch, input_dim), jnp.float32)

    y = jax.jit(linear_forward)(x, weight, bias)
    jax.block_until_ready(y)
    y_ref = x @ weight.T + bias
    assert y.shape == (batch, output_dim)
    assert jnp.allclose(y, y_ref, atol=1e-5, rtol=1e-5)   # small path is exact f32

    # Exercise the tiled path (ragged M, ragged-N last block, bias init,
    # in-place f32 accumulation) at a realistic size.
    k2 = jax.random.PRNGKey(1)
    kx2, kw2, kb2 = jax.random.split(k2, 3)
    M2, K2, N2 = 1000, 768, 640
    x2 = jax.random.normal(kx2, (M2, K2), jnp.float32)
    w2 = jax.random.normal(kw2, (N2, K2), jnp.float32) * 0.02
    b2 = jax.random.normal(kb2, (N2,), jnp.float32)
    y2_ref = x2 @ w2.T + b2

    # Exact-f32 tiled variant (validates tiling / ragged-edge logic tightly).
    y2_f32 = jax.jit(functools.partial(linear_forward, use_bf16_inputs=False))(x2, w2, b2)
    jax.block_until_ready(y2_f32)
    assert y2_f32.shape == (M2, N2)
    assert jnp.allclose(y2_f32, y2_ref, atol=1e-3, rtol=1e-3)

    # Default bf16-input variant: f32 accumulation keeps agreement at ~1e-3
    # level; tolerance documented accordingly.
    y2 = jax.jit(linear_forward)(x2, w2, b2)
    jax.block_until_ready(y2)
    assert jnp.allclose(y2, y2_ref, atol=1e-2, rtol=1e-2)

    print("KERNEL_OK")
</pallas_src>

<mosaic_0001>
module attributes {stable_mosaic.version = 11 : i64} {
  func.func @_linear_small_kernel(%arg0: memref<8x32xf32, #tpu.memory_space<vmem>>, %arg1: memref<128x32xf32, #tpu.memory_space<vmem>>, %arg2: memref<1x128xf32, #tpu.memory_space<vmem>>, %arg3: memref<8x128xf32, #tpu.memory_space<vmem>>) attributes {dimension_semantics = [], scalar_prefetch = 0 : i64, scratch_operands = 0 : i64, tpu.core_type = #tpu.core_type<tc>} {
    %c0 = arith.constant 0 : index
    %c0_0 = arith.constant 0 : index
    %0 = vector.load %arg0[%c0, %c0_0] : memref<8x32xf32, #tpu.memory_space<vmem>>, vector<8x32xf32>
    %c0_1 = arith.constant 0 : index
    %c0_2 = arith.constant 0 : index
    %1 = vector.load %arg1[%c0_1, %c0_2] : memref<128x32xf32, #tpu.memory_space<vmem>>, vector<128x32xf32>
    %cst = arith.constant dense<0.000000e+00> : vector<8x128xf32>
    %2 = tpu.matmul %0, %1, %cst {dimension_numbers = #tpu.dot_dimension_numbers<[1], [1], [0], [0], [0, 0, 1, 0], [], []>} : vector<8x32xf32>, vector<128x32xf32>, vector<8x128xf32> -> vector<8x128xf32>
    %c0_3 = arith.constant 0 : index
    %c0_4 = arith.constant 0 : index
    %3 = vector.load %arg2[%c0_3, %c0_4] : memref<1x128xf32, #tpu.memory_space<vmem>>, vector<1x128xf32>
    %4 = vector.broadcast %3 : vector<1x128xf32> to vector<8x128xf32>
    %5 = arith.addf %2, %4 : vector<8x128xf32>
    %c0_5 = arith.constant 0 : index
    %c0_6 = arith.constant 0 : index
    %6 = vector.load %arg3[%c0_5, %c0_6] : memref<8x128xf32, #tpu.memory_space<vmem>>, vector<8x128xf32>
    tpu.vector_store %arg3[%c0_5, %c0_6], %5 {strides = array<i32>} : memref<8x128xf32, #tpu.memory_space<vmem>>, vector<8x128xf32>,
    return
  }
}

</mosaic_0001>

<bundles_post_ra>
// kernel: linear_forward.1
= control target key start
LH: loop header
LB: loop body
LE: loop exit
PB: predicated region body
PF: predicated region fallthrough
CT: control target
= control target key end

     0   :  { %vm39_vm0 = vcmask 261120   ;;  %v306_v2 = vmov 0.0|0.0   ;;  %vm307_vm2 = vmmov 0   ;;  %v308_v5 = vmov 0.0   ;;  %s419_s0 = inlined_call_operand.vmem [shape: f32[8,32], index: 0, kind: input, shape index: {}]   ;;  %s420_s1 = inlined_call_operand.vmem [shape: f32[128,32], index: 1, kind: input, shape index: {}]   ;;  %s421_s2 = inlined_call_operand.vmem [shape: f32[1,128], index: 2, kind: input, shape index: {}]   ;;  %s422_s3 = inlined_call_operand.hbm [shape: f32[8,128], index: 3, kind: output, shape index: {}]  }
   0x1   :  { %v16_v0 = vld [vmem:[%s420_s1] sm:$0xff]  ;;  %v17_v1 = vld [vmem:[%s420_s1 + $0x8] sm:$0xff]  ;;  %246 = vmatprep.subr.bf16.mxu0 %v306_v2  ;;  %vm338_vm1 = vmpackc.low %vm39_vm0, %vm39_vm0  ;;  %243 = vmatprep.mubr.msk.f32.mxu0 %vm307_vm2, %v308_v5 }
   0x2   :  { %v247_v3 = vpack.c.bf16 %v17_v1, %v16_v0  ;;  %v18_v6 = vld [vmem:[%s420_s1 + $0x10] sm:$0xff]  ;;  %v19_v7 = vld [vmem:[%s420_s1 + $0x18] sm:$0xff] }
   0x4   :  { %249 = vmatpush3.bf16.xpose.msk.msra.mxu0 %vm338_vm1, %v247_v3 }
   0x5   :  { %250 = vmatprep.subr.bf16.mxu0 %v306_v2 }
   0x6   :  { %8 = vsyncpa [#allocation3], 0  ;;  %v251_v8 = vpack.c.bf16 %v19_v7, %v18_v6  ;;  %v20_v9 = vld [vmem:[%s420_s1 + $0x20] sm:$0xff]  ;;  %v21_v10 = vld [vmem:[%s420_s1 + $0x28] sm:$0xff]  ;;  %s309_s21 = smov [#allocation2]  }
   0x7   :  { %v255_v11 = vpack.c.bf16 %v21_v10, %v20_v9  ;;  %v22_v12 = vld [vmem:[%s420_s1 + $0x30] sm:$0xff]  ;;  %v23_v13 = vld [vmem:[%s420_s1 + $0x38] sm:$0xff]  ;;  %v24_v15 = vld [vmem:[%s420_s1 + $0x40] sm:$0xff]  ;;  %s168_s22 = sshll.u32 %s309_s21, 4  ;;  %s169_s22 = int_to_ptr.vmem [resolvable:$true] %s168_s22 }
   0x8   :  { %v259_v14 = vpack.c.bf16 %v23_v13, %v22_v12  ;;  %v25_v16 = vld [vmem:[%s420_s1 + $0x48] sm:$0xff]  ;;  %v26_v18 = vld [vmem:[%s420_s1 + $0x50] sm:$0xff]  ;;  %v27_v19 = vld [vmem:[%s420_s1 + $0x58] sm:$0xff]  ;;  %p287_p1 = scmp.lt.s32.totalorder %s169_s22, %s169_s22 }
   0x9   :  { %v263_v17 = vpack.c.bf16 %v25_v16, %v24_v15  ;;  %v267_v20 = vpack.c.bf16 %v27_v19, %v26_v18  ;;  %v28_v21 = vld [vmem:[%s420_s1 + $0x60] sm:$0xff]  ;;  %v29_v22 = vld [vmem:[%s420_s1 + $0x68] sm:$0xff]  ;;  %v30_v24 = vld [vmem:[%s420_s1 + $0x70] sm:$0xff] }
   0xa   :  { %v271_v23 = vpack.c.bf16 %v29_v22, %v28_v21  ;;  %v31_v25 = vld [vmem:[%s420_s1 + $0x78] sm:$0xff]  ;;  %v15_v27 = vld [vmem:[%s419_s0] sm:$0xff]  ;;  %s282_s1 = scalar_lea.vmem %s169_s22, 128 }
   0xb   :  { %v275_v26 = vpack.c.bf16 %v31_v25, %v30_v24  ;;  %v176_v28 = vld [vmem:[%s421_s2] ss:$0 sm:$0xff]  ;;  %p283_p0 = scmp.ne.s32.totalorder %s169_s22, %s282_s1  ;;  %p288_p2 = scmp.lt.s32.totalorder %s282_s1, %s282_s1 }
   0xc   :  { %253 = vmatpush3.bf16.xpose.msk.msra.mxu0 %vm338_vm1, %v251_v8 }
   0xd   :  { %254 = vmatprep.subr.bf16.mxu0 %v306_v2  ;;  %p289_p3 = por %p288_p2, %p287_p1 }
   0xf   :  { %p290_p4 = pnand %p289_p3, %p283_p0 }
  0x14   :  { %257 = vmatpush3.bf16.xpose.msk.msra.mxu0 %vm338_vm1, %v255_v11 }
  0x15   :  { %258 = vmatprep.subr.bf16.mxu0 %v306_v2 }
  0x1c   :  { %261 = vmatpush3.bf16.xpose.msk.msra.mxu0 %vm338_vm1, %v259_v14 }
  0x1d   :  { %262 = vmatprep.subr.bf16.mxu0 %v306_v2 }
  0x24   :  { %265 = vmatpush3.bf16.xpose.msk.msra.mxu0 %vm338_vm1, %v263_v17 }
  0x25   :  { %266 = vmatprep.subr.bf16.mxu0 %v306_v2 }
  0x2c   :  { %269 = vmatpush3.bf16.xpose.msk.msra.mxu0 %vm338_vm1, %v267_v20 }
  0x2d   :  { %270 = vmatprep.subr.bf16.mxu0 %v306_v2 }
  0x34   :  { %273 = vmatpush3.bf16.xpose.msk.msra.mxu0 %vm338_vm1, %v271_v23 }
  0x35   :  { %274 = vmatprep.subr.bf16.mxu0 %v306_v2 }
  0x3c   :  { %277 = vmatpush3.bf16.xpose.msk.msra.mxu0 %vm338_vm1, %v275_v26 }
  0x43   :  { %244 = vmatmul.mubr.msk.f32.vlgmr.msra.gmra.mrb[0].mxu0 %vm39_vm0, %v15_v27 }
 0x116   :  { %v157_v29 = vpop.f32.mrb[0].mxu0 }
 0x117   :  { %v158_v30 = vadd.f32 %v176_v28, %v157_v29  ;;  %v245_v31 = vpop.f32.mrb[1].mxu0 }
 0x119   :  { %161 = vst [vmem:[#allocation2] sm:$0xff] %v158_v30 }
 0x11a   :  { %293 = shalt.err (!%p290_p4)
}
 0x11b   :  { %s294_s24 = scalar_lea.hbm %s422_s3, 128 }
 0x11c   :  { %p295_p5 = scmp.ne.s32.totalorder %s422_s3, %s294_s24  ;;  %p298_p6 = scmp.lt.u32.totalorder %s294_s24, %s422_s3 }
 0x11e   :  { %p300_p7 = pnand %p298_p6, %p295_p5 }
 0x120   :  { %303 = shalt.err (!%p300_p7)
}
 0x121   :  { %171 = dma.vmem_to_hbm [thread:$0]  %s169_s22, 128, %s422_s3, [#allocation3]  }
 0x122   :  { %304 = dma.done.wait [#allocation3], 128  }
 0x123   :  { %305 = vsyncadd [#allocation3], 4294967168 }
 0x124   :  { %175 = vsyncpa [#allocation3], 1 }

</bundles_post_ra>
